<compile_context>
chip_gen: v5e
topology: v5e:2x2
jax: 0.10.0
libtpu: 0.0.40
codegen_flags: <defaults>
</compile_context>

<pallas_src>
import functools

import jax
import jax.numpy as jnp
from jax.experimental import pallas as pl
from jax.experimental.pallas import tpu as pltpu

LANE = 128      # lane width of a vreg (last-dim tiling unit)
SUBLANE = 8     # sublane count of a vreg (second-to-last-dim tiling unit)

# Conservative usable VMEM budget per core: v7x has 64 MiB total, v5e/v6e 128 MiB.
_VMEM_BUDGET = 48 << 20


def _round_up(n, m):
    return pl.cdiv(n, m) * m


def _vmem_bytes(tb, tk, tn, itemsize, w_bufs):
    """Estimated VMEM residency for one grid step's working set."""
    return (2 * tb * tk * itemsize       # x tiles (double-buffered)
            + w_bufs * tk * tn * itemsize  # weight tiles
            + w_bufs * tn * 4              # bias tiles
            + 2 * tb * tn * 4              # output tiles (double-buffered)
            + tb * tn * 4)                 # f32 accumulator scratch


def _choose_tiles(B, D_in, D_out, block_b, itemsize):
    """Pick (TB, TN, TK) so the working set fits the per-core VMEM budget."""
    # Output tile over D_out: keep the natural (unpadded) width when it fits
    # (tiny D_out -> masked store on a tiny write beats 16x padded writeback);
    # tile at 512 lanes for wide models so the weight block stays bounded.
    TN = D_out if D_out <= 512 else 512

    TB = min(_round_up(B, SUBLANE), _round_up(block_b, SUBLANE))
    # v7x has 2 TensorCores: make sure a modest batch still yields >= 2
    # "parallel" grid steps so both cores get work (no effect on v5e/v6e).
    if B > SUBLANE and pl.cdiv(B, TB) < 2:
        TB = _round_up(pl.cdiv(B, 2), SUBLANE)

    TK = D_in
    # Shrink the batch tile first (streaming efficiency is already high at
    # 256+ rows), then split the contraction axis.
    while _vmem_bytes(TB, TK, TN, itemsize, 1) > _VMEM_BUDGET and TB > 32 * SUBLANE:
        TB = _round_up(TB // 2, SUBLANE)
    if _vmem_bytes(TB, TK, TN, itemsize, 1) > _VMEM_BUDGET:
        # K tiles must evenly divide D_in: OOB garbage in a ragged contraction
        # block would contaminate valid outputs.
        divisors = [k for k in range(LANE, D_in, LANE)
                    if D_in % k == 0
                    and _vmem_bytes(TB, k, TN, itemsize, 2) <= _VMEM_BUDGET]
        if divisors:
            TK = max(divisors)
        # TODO(synk): pad D_in once at setup when it has no suitable
        # 128-multiple divisor instead of exceeding the VMEM budget.
    return TB, TN, TK


def logreg_kernel(x_ref, w_ref, b_ref, o_ref, acc_ref):
    """Grid = (batch tiles, D_out tiles, D_in tiles); the K axis is last ('arbitrary')."""
    k = pl.program_id(2)

    @pl.when(k == 0)
    def _():
        acc_ref[...] = jnp.zeros_like(acc_ref)

    # x tile (TB, TK) @ weight tile (TK, TN); the weight was transposed once at
    # setup, so the MXU contracts a plain row-major tile (no per-step transpose).
    acc_ref[...] += jnp.dot(x_ref[...], w_ref[...],
                            preferred_element_type=jnp.float32)

    @pl.when(k == pl.num_programs(2) - 1)
    def _():
        z = acc_ref[...] + b_ref[...]
        # sigmoid(z) = 0.5*tanh(0.5*z) + 0.5: one EUP transcendental per element
        # (vs exp + reciprocal) and exact (no approx-reciprocal error term).
        o_ref[...] = (0.5 * jnp.tanh(0.5 * z) + 0.5).astype(o_ref.dtype)


def prepare_params(weight, bias, compute_dtype=jnp.float32):
    """One-time parameter preparation, hoisted out of the per-call path.

    * Transposes the PyTorch-layout weight (D_out, D_in) -> (D_in, D_out) once.
    * Reshapes the bias to a (1, D_out) row for sublane broadcast.
    * compute_dtype=jnp.bfloat16 enables low-precision streaming (halved HBM
      traffic, bf16-native MXU); accumulation stays f32 inside the kernel.
    """
    w_t = jnp.asarray(weight, compute_dtype).T          # (D_in, D_out)
    b_row = jnp.asarray(bias, jnp.float32).reshape(1, -1)
    return w_t, b_row


@functools.partial(jax.jit, static_argnames=("block_b",))
def logistic_regression(x, w_t, b_row, *, block_b=1024):
    """x: (B, D_in). w_t: (D_in, D_out) pre-transposed weight. b_row: (1, D_out).
    Returns sigmoid(x @ w_t + b_row), shape (B, D_out), f32."""
    B, D_in = x.shape
    D_in_w, D_out = w_t.shape
    assert D_in == D_in_w, "x / weight inner-dim mismatch"

    # Match the x stream to the weight's storage dtype (no-op for f32).
    if x.dtype != w_t.dtype:
        x = x.astype(w_t.dtype)

    itemsize = jnp.dtype(w_t.dtype).itemsize
    TB, TN, TK = _choose_tiles(B, D_in, D_out, block_b, itemsize)

    # Ragged last blocks are masked by Pallas: no wrapper-side pad/slice passes.
    grid_b = pl.cdiv(B, TB)
    grid_n = pl.cdiv(D_out, TN)
    grid_k = pl.cdiv(D_in, TK)

    # Single-buffer the fully-replicated weight/bias tiles only when the tile is
    # big enough for the residency saving to matter (v7x 64 MiB hazard for large
    # models); tiny weights keep the default double buffering.
    replicated = (grid_n == 1 and grid_k == 1)
    big_weight = TK * TN * itemsize >= (1 << 20)
    wb_mode = pl.Buffered(1) if (replicated and big_weight) else None
    w_bufs = 1 if wb_mode is not None else 2

    vmem_limit = max(
        16 << 20,
        min(int(_vmem_bytes(TB, TK, TN, itemsize, w_bufs) * 1.25) + (2 << 20),
            64 << 20),
    )

    return pl.pallas_call(
        logreg_kernel,
        out_shape=jax.ShapeDtypeStruct((B, D_out), jnp.float32),
        grid_spec=pltpu.PrefetchScalarGridSpec(
            num_scalar_prefetch=0,
            grid=(grid_b, grid_n, grid_k),
            in_specs=[
                pl.BlockSpec((TB, TK), lambda i, j, k: (i, k)),   # x: batch x K tiles
                pl.BlockSpec((TK, TN), lambda i, j, k: (k, j),    # weight (pre-transposed)
                             pipeline_mode=wb_mode),
                pl.BlockSpec((1, TN), lambda i, j, k: (0, j),     # bias row
                             pipeline_mode=wb_mode),
            ],
            out_specs=pl.BlockSpec((TB, TN), lambda i, j, k: (i, j)),
            scratch_shapes=[pltpu.VMEM((TB, TN), jnp.float32)],
        ),
        compiler_params=pltpu.CompilerParams(
            dimension_semantics=("parallel", "parallel", "arbitrary"),
            vmem_limit_bytes=vmem_limit,
        ),
    )(x, w_t, b_row)


def reference(x, weight, bias):
    return jax.nn.sigmoid(x @ weight.T + bias)


if __name__ == "__main__":
    key = jax.random.PRNGKey(0)
    kx, kw, kb, kx2, kw3, kb3, kx3 = jax.random.split(key, 7)

    # Tolerances cover TPU default matmul precision (bf16 MXU passes) differing
    # between the Pallas kernel and the XLA reference.
    TOL = 3e-3

    # --- Shipped module shape: batch=8, input_dim=32, output_dim=8 ---
    B, D_in, D_out = 8, 32, 8
    x = jax.random.normal(kx, (B, D_in), dtype=jnp.float32)
    bound = 1.0 / (D_in ** 0.5)
    weight = jax.random.uniform(kw, (D_out, D_in), minval=-bound, maxval=bound,
                                dtype=jnp.float32)
    bias = jax.random.uniform(kb, (D_out,), minval=-bound, maxval=bound,
                              dtype=jnp.float32)

    w_t, b_row = prepare_params(weight, bias)              # one-time setup
    out = jax.block_until_ready(logistic_regression(x, w_t, b_row))
    assert out.shape == (B, D_out)
    assert jnp.allclose(out, reference(x, weight, bias), atol=TOL, rtol=TOL), \
        "mismatch vs reference (small batch)"

    # --- Ragged multi-tile batch: 300 rows, 128-row tiles -> 3 grid steps ---
    B2 = 300
    x2 = jax.random.normal(kx2, (B2, D_in), dtype=jnp.float32)
    out2 = jax.block_until_ready(logistic_regression(x2, w_t, b_row, block_b=128))
    assert out2.shape == (B2, D_out)
    assert jnp.allclose(out2, reference(x2, weight, bias), atol=TOL, rtol=TOL), \
        "mismatch vs reference (ragged batch tiles)"

    # --- Wider model exercising the D_out grid axis (2 x 2 x 1 grid) ---
    B3, D_in3, D_out3 = 64, 256, 1024
    bound3 = 1.0 / (D_in3 ** 0.5)
    weight3 = jax.random.uniform(kw3, (D_out3, D_in3), minval=-bound3, maxval=bound3,
                                 dtype=jnp.float32)
    bias3 = jax.random.uniform(kb3, (D_out3,), minval=-bound3, maxval=bound3,
                               dtype=jnp.float32)
    x3 = jax.random.normal(kx3, (B3, D_in3), dtype=jnp.float32)
    w_t3, b_row3 = prepare_params(weight3, bias3)
    out3 = jax.block_until_ready(logistic_regression(x3, w_t3, b_row3))
    assert out3.shape == (B3, D_out3)
    assert jnp.allclose(out3, reference(x3, weight3, bias3), atol=TOL, rtol=TOL), \
        "mismatch vs reference (tiled D_out)"

    # --- bf16 streaming option (f32 accumulate / f32 epilogue), looser tol ---
    w_t3_bf, b_row3_bf = prepare_params(weight3, bias3, compute_dtype=jnp.bfloat16)
    out3_bf = jax.block_until_ready(logistic_regression(x3, w_t3_bf, b_row3_bf))
    assert out3_bf.shape == (B3, D_out3)
    assert jnp.allclose(out3_bf, reference(x3, weight3, bias3), atol=2e-2, rtol=2e-2), \
        "mismatch vs reference (bf16 streaming)"

    print("KERNEL_OK")
</pallas_src>

<mosaic_0001>
module attributes {stable_mosaic.version = 11 : i64} {
  func.func @logreg_kernel(%arg0: i32, %arg1: i32, %arg2: i32, %arg3: memref<8x32xf32, #tpu.memory_space<vmem>>, %arg4: memref<32x8xf32, #tpu.memory_space<vmem>>, %arg5: memref<1x8xf32, #tpu.memory_space<vmem>>, %arg6: memref<8x8xf32, #tpu.memory_space<vmem>>, %arg7: memref<8x8xf32, #tpu.memory_space<vmem>>) attributes {dimension_semantics = [#tpu.dimension_semantics<parallel>, #tpu.dimension_semantics<parallel>, #tpu.dimension_semantics<arbitrary>], iteration_bounds = array<i64: 1, 1, 1>, scalar_prefetch = 0 : i64, scratch_operands = 1 : i64, tpu.core_type = #tpu.core_type<tc>, window_params = [{transform_indices = @transform_0, window_bounds = array<i64: 8, 32>}, {transform_indices = @transform_1, window_bounds = array<i64: 32, 8>}, {transform_indices = @transform_2, window_bounds = array<i64: 1, 8>}, {transform_indices = @transform_3, window_bounds = array<i64: 8, 8>}]} {
    %c0_i32 = arith.constant 0 : i32
    %0 = arith.cmpi eq, %arg2, %c0_i32 : i32
    %1 = arith.extui %0 : i1 to i32
    %c0_i32_0 = arith.constant 0 : i32
    %2 = arith.cmpi ne, %1, %c0_i32_0 : i32
    scf.if %2 {
      %cst_10 = arith.constant 0.000000e+00 : f32
      %12 = vector.broadcast %cst_10 : f32 to vector<8x8xf32>
      %c0_11 = arith.constant 0 : index
      %c0_12 = arith.constant 0 : index
      %13 = vector.load %arg7[%c0_11, %c0_12] : memref<8x8xf32, #tpu.memory_space<vmem>>, vector<8x8xf32>
      tpu.vector_store %arg7[%c0_11, %c0_12], %12 {strides = array<i32>} : memref<8x8xf32, #tpu.memory_space<vmem>>, vector<8x8xf32>,
    } else {
    }
    %c0 = arith.constant 0 : index
    %c0_1 = arith.constant 0 : index
    %3 = vector.load %arg7[%c0, %c0_1] : memref<8x8xf32, #tpu.memory_space<vmem>>, vector<8x8xf32>
    %c0_2 = arith.constant 0 : index
    %c0_3 = arith.constant 0 : index
    %4 = vector.load %arg3[%c0_2, %c0_3] : memref<8x32xf32, #tpu.memory_space<vmem>>, vector<8x32xf32>
    %c0_4 = arith.constant 0 : index
    %c0_5 = arith.constant 0 : index
    %5 = vector.load %arg4[%c0_4, %c0_5] : memref<32x8xf32, #tpu.memory_space<vmem>>, vector<32x8xf32>
    %cst = arith.constant dense<0.000000e+00> : vector<8x8xf32>
    %6 = tpu.matmul %4, %5, %cst {dimension_numbers = #tpu.dot_dimension_numbers<[1], [0], [0], [1], [0, 0, 1, 1], [], []>} : vector<8x32xf32>, vector<32x8xf32>, vector<8x8xf32> -> vector<8x8xf32>
    %7 = arith.addf %3, %6 : vector<8x8xf32>
    %c0_6 = arith.constant 0 : index
    %c0_7 = arith.constant 0 : index
    %8 = vector.load %arg7[%c0_6, %c0_7] : memref<8x8xf32, #tpu.memory_space<vmem>>, vector<8x8xf32>
    tpu.vector_store %arg7[%c0_6, %c0_7], %7 {strides = array<i32>} : memref<8x8xf32, #tpu.memory_space<vmem>>, vector<8x8xf32>,
    %c0_i32_8 = arith.constant 0 : i32
    %9 = arith.cmpi eq, %arg2, %c0_i32_8 : i32
    %10 = arith.extui %9 : i1 to i32
    %c0_i32_9 = arith.constant 0 : i32
    %11 = arith.cmpi ne, %10, %c0_i32_9 : i32
    scf.if %11 {
      %c0_10 = arith.constant 0 : index
      %c0_11 = arith.constant 0 : index
      %12 = vector.load %arg7[%c0_10, %c0_11] : memref<8x8xf32, #tpu.memory_space<vmem>>, vector<8x8xf32>
      %c0_12 = arith.constant 0 : index
      %c0_13 = arith.constant 0 : index
      %13 = vector.load %arg5[%c0_12, %c0_13] : memref<1x8xf32, #tpu.memory_space<vmem>>, vector<1x8xf32>
      %14 = vector.broadcast %13 : vector<1x8xf32> to vector<8x8xf32>
      %15 = arith.addf %12, %14 : vector<8x8xf32>
      %cst_14 = arith.constant 5.000000e-01 : f32
      %16 = vector.broadcast %cst_14 : f32 to vector<8x8xf32>
      %17 = arith.mulf %16, %15 : vector<8x8xf32>
      %18 = math.tanh %17 : vector<8x8xf32>
      %cst_15 = arith.constant 5.000000e-01 : f32
      %19 = vector.broadcast %cst_15 : f32 to vector<8x8xf32>
      %20 = arith.mulf %19, %18 : vector<8x8xf32>
      %cst_16 = arith.constant 5.000000e-01 : f32
      %21 = vector.broadcast %cst_16 : f32 to vector<8x8xf32>
      %22 = arith.addf %20, %21 : vector<8x8xf32>
      %c0_17 = arith.constant 0 : index
      %c0_18 = arith.constant 0 : index
      %23 = vector.load %arg6[%c0_17, %c0_18] : memref<8x8xf32, #tpu.memory_space<vmem>>, vector<8x8xf32>
      tpu.vector_store %arg6[%c0_17, %c0_18], %22 {strides = array<i32>} : memref<8x8xf32, #tpu.memory_space<vmem>>, vector<8x8xf32>,
    } else {
    }
    return
  }
  func.func @transform_0(%arg0: i32, %arg1: i32, %arg2: i32) -> (i32, i32) {
    %c0_i32 = arith.constant 0 : i32
    return %arg0, %arg2 : i32, i32
  }
  func.func @transform_1(%arg0: i32, %arg1: i32, %arg2: i32) -> (i32, i32) {
    %c0_i32 = arith.constant 0 : i32
    return %arg2, %arg1 : i32, i32
  }
  func.func @transform_2(%arg0: i32, %arg1: i32, %arg2: i32) -> (i32, i32) {
    %c0_i32 = arith.constant 0 : i32
    %c0_i32_0 = arith.constant 0 : i32
    return %c0_i32, %arg1 : i32, i32
  }
  func.func @transform_3(%arg0: i32, %arg1: i32, %arg2: i32) -> (i32, i32) {
    %c0_i32 = arith.constant 0 : i32
    return %arg0, %arg1 : i32, i32
  }
}

</mosaic_0001>

<bundles_post_ra>
// kernel: logistic_regression.1
= control target key start
LH: loop header
LB: loop body
LE: loop exit
PB: predicated region body
PF: predicated region fallthrough
CT: control target
= control target key end

     0   :  { %vm19_vm0 = vcmask 64512   ;;  %v116_v2 = vmov 0.0   ;;  %s162_s0 = inlined_call_operand.vmem [shape: f32[8,32], index: 0, kind: input, shape index: {}]   ;;  %s163_s1 = inlined_call_operand.vmem [shape: f32[32,8], index: 1, kind: input, shape index: {}]   ;;  %s164_s2 = inlined_call_operand.vmem [shape: f32[1,8], index: 2, kind: input, shape index: {}]   ;;  %s165_s3 = inlined_call_operand.hbm [shape: f32[8,8], index: 3, kind: output, shape index: {}]  }
   0x1   :  { %v26_v0 = vld [vmem:[%s163_s1 + $0x18] sm:$0xff]  ;;  %v25_v1 = vld [vmem:[%s163_s1 + $0x10] sm:$0xff]  ;;  %20 = vst.msk [vmem:[#allocation2] sm:$0xff] %vm19_vm0, %v116_v2 }
   0x2   :  { %43 = vmatpush.msra.mxu0 %v26_v0 }
   0x3   :  { %8 = vsyncpa [#allocation4], 0  ;;  %v24_v3 = vld [vmem:[%s163_s1 + $0x8] sm:$0xff]  ;;  %v23_v4 = vld [vmem:[%s163_s1] sm:$0xff]  ;;  %vm27_vm1 = vcmask 261120   ;;  %s117_s1 = smov [#allocation3]  }
   0x4   :  { %44 = vmatpush.msra.mxu0 %v25_v1  ;;  %v22_v5 = vld [vmem:[%s162_s0] sm:$0xff]  ;;  %s73_s24 = sshll.u32 %s117_s1, 4  ;;  %s75_s26 = sshll.u32 %s165_s3, 4  ;;  %s74_s24 = int_to_ptr.vmem [resolvable:$true] %s73_s24  ;;  %s76_s26 = int_to_ptr.hbm [resolvable:$true] %s75_s26 }
   0x5   :  { %v87_v9 = vld [vmem:[%s164_s2] ss:$0 sm:$0xff] }
   0x6   :  { %45 = vmatpush.msra.mxu0 %v24_v3 }
   0x8   :  { %46 = vmatpush.msra.mxu0 %v23_v4  ;;  %v21_v6 = vld [vmem:[#allocation2] sm:$0xff] }
   0x9   :  { %84 = vmatmul.msk.f32.vlgmr.msra.gmra.mxu0 %vm27_vm1, %v22_v5 }
  0x86   :  { %v48_v7 = vpop.f32.mrf.mxu0 }
  0x87   :  { %v51_v8 = vadd.f32 %v48_v7, %v21_v6 }
  0x89   :  { %53 = vst.msk [vmem:[#allocation2] sm:$0xff] %vm19_vm0, %v51_v8 }
  0x90   :  { %v57_v10 = vld [vmem:[#allocation2] sm:$0xff] }
  0x91   :  { %v62_v11 = vadd.f32 %v87_v9, %v57_v10 }
  0x93   :  { %v63_v12 = vmul.f32 0.5, %v62_v11 }
  0x95   :  { %88 = vtanh.f32 %v63_v12 }
  0x9b   :  { %v89_v13 = vpop.eup %88 }
  0x9c   :  { %v65_v14 = vmul.f32 0.5, %v89_v13 }
  0x9e   :  { %v66_v15 = vadd.f32 0.5, %v65_v14 }
  0xa0   :  { %67 = vst.msk [vmem:[#allocation3] sm:$0xff] %vm19_vm0, %v66_v15 }
  0xa1   :  { %78 = dma.vmem_to_hbm [thread:$0]  %s74_s24, 128, %s76_s26, [#allocation4]  }
  0xa2   :  { %114 = dma.done.wait [#allocation4], 128  }
  0xa3   :  { %115 = vsyncadd [#allocation4], 4294967168 }
  0xa4   :  { %83 = vsyncpa [#allocation4], 1 }

</bundles_post_ra>
